<compile_context>
chip_gen: v7x
topology: tpu7x:2x2x1
jax: 0.10.0
libtpu: 0.0.40
codegen_flags: <defaults>
</compile_context>

<pallas_src>
import numpy as np
import jax
import jax.numpy as jnp
from jax.experimental import pallas as pl
from jax.experimental.pallas import tpu as pltpu


def _moving_avg_kernel(a_ref, x_ref, o_ref):
    # a_ref: (tl_out, L) pad+pool matrix tile (same dtype as x, resident /
    #        re-used across the batch and channel grid axes).
    # x_ref: (Bt, L, ct) input tile.   o_ref: (Bt, tl_out, ct) output tile.
    a = a_ref[...]
    for b in range(x_ref.shape[0]):          # Bt is small & static -> unrolled
        y = jnp.dot(a, x_ref[b], preferred_element_type=jnp.float32)
        o_ref[b] = y.astype(o_ref.dtype)


def _build_avg_matrix(L, kernel_size, stride):
    """Static (L_out, L) matrix folding replicate padding + average pooling."""
    pad = (kernel_size - 1) // 2
    L_out = (L + 2 * pad - kernel_size) // stride + 1
    t = np.repeat(np.arange(L_out), kernel_size)
    k = np.tile(np.arange(kernel_size), L_out)
    src = np.clip(t * stride + k - pad, 0, L - 1)       # replicate-pad clamp
    a = np.zeros((L_out, L), dtype=np.float32)
    np.add.at(a, (t, src), np.float32(1.0 / kernel_size))
    return a, L_out


def _vmem_capacity_bytes():
    try:
        cap = int(pltpu.get_tpu_info().vmem_capacity_bytes)
        if 32 * 2**20 <= cap <= 512 * 2**20:
            return cap
    except Exception:
        pass
    return 64 * 2**20                         # conservative (v7x-sized) fallback


def _round_up(v, m):
    return (v + m - 1) // m * m


def moving_avg(x, kernel_size: int, stride: int, *, block_rows=None):
    """x: (B, L, C) float array. Returns (B, L_out, C); matches the torch module."""
    B, L, C = x.shape
    a_np, L_out = _build_avg_matrix(L, kernel_size, stride)
    a = jnp.asarray(a_np, dtype=x.dtype)      # bf16 in -> bf16 A -> 1-pass MXU

    itemsize = jnp.dtype(x.dtype).itemsize

    # Generation-aware block budget: ~8 MiB blocks on 64 MiB-VMEM chips (v7x),
    # ~20 MiB on 128 MiB-VMEM chips (v5e / v6e).
    vmem_cap = _vmem_capacity_bytes()
    block_budget = 8 * 2**20 if vmem_cap <= 96 * 2**20 else 20 * 2**20

    # --- C tiling: multiple-of-128 divisor, >= ~512 contiguous bytes per DMA row.
    ct = C
    if C % 128 == 0:
        min_ct = 128 if itemsize >= 4 else 256
        cands = [d for d in range(C, 127, -128) if C % d == 0 and d >= min_ct]
        if cands:
            ct = next((d for d in cands
                       if (L + L_out) * d * itemsize <= block_budget), cands[-1])
    n_ct = pl.cdiv(C, ct)

    # --- L_out tiling of A / output so A (x2 pipeline buffers) fits the budget.
    a_row_bytes = L * itemsize
    if block_rows is not None:
        tl_out = min(L_out, max(8, _round_up(int(block_rows), 8)))
    elif 2 * L_out * a_row_bytes <= block_budget or L_out <= 8:
        tl_out = L_out
    else:
        tl_out = min(L_out, max(8, (block_budget // (2 * a_row_bytes)) // 8 * 8))
    n_t = pl.cdiv(L_out, tl_out)

    # --- Fold batches into the block to amortize per-grid-step overhead.
    per_b = (L + tl_out) * ct * itemsize
    bt = int(min(B, 16, max(1, block_budget // max(per_b, 1))))
    n_b = pl.cdiv(B, bt)

    # --- v7x has 2 TensorCores: ensure the grid has >= 2 parallel slices.
    if n_b * n_ct * n_t == 1:
        if B >= 2:
            bt = -(-B // 2)
            n_b = pl.cdiv(B, bt)
        elif L_out >= 16:
            tl_out = max(8, _round_up(-(-L_out // 2), 8))
            n_t = pl.cdiv(L_out, tl_out)

    # --- VMEM limit: double-buffered x/out + double-buffered A + slack.
    needed = (2 * bt * (L + tl_out) * ct * itemsize
              + 2 * tl_out * L * itemsize + (2 << 20))
    cap = min(int(0.85 * vmem_cap), 100 * 2**20)
    vmem_limit = int(min(max(needed * 3 // 2, 32 * 2**20), cap))

    return pl.pallas_call(
        _moving_avg_kernel,
        out_shape=jax.ShapeDtypeStruct((B, L_out, C), x.dtype),
        grid_spec=pltpu.PrefetchScalarGridSpec(
            num_scalar_prefetch=0,
            grid=(n_b, n_ct, n_t),
            in_specs=[
                pl.BlockSpec((tl_out, L), lambda b, c, t: (t, 0)),
                pl.BlockSpec((bt, L, ct), lambda b, c, t: (b, 0, c)),
            ],
            out_specs=pl.BlockSpec((bt, tl_out, ct), lambda b, c, t: (b, t, c)),
        ),
        compiler_params=pltpu.CompilerParams(
            dimension_semantics=("parallel", "parallel", "parallel"),
            vmem_limit_bytes=vmem_limit,
        ),
    )(a, x)


def moving_avg_ref(x, kernel_size: int, stride: int):
    """Pure-JAX reference matching the PyTorch module (exact f32)."""
    B, L, C = x.shape
    xf = x.astype(jnp.float32)
    pad = (kernel_size - 1) // 2
    front = jnp.repeat(xf[:, 0:1, :], pad, axis=1)
    end = jnp.repeat(xf[:, L - 1:L, :], pad, axis=1)
    xp = jnp.concatenate([front, xf, end], axis=1)
    L_pad = xp.shape[1]
    L_out = (L_pad - kernel_size) // stride + 1
    windows = jnp.stack(
        [xp[:, t * stride: t * stride + kernel_size, :] for t in range(L_out)],
        axis=1,
    )  # (B, L_out, K, C)
    return windows.mean(axis=2)


if __name__ == "__main__":
    keys = jax.random.split(jax.random.PRNGKey(0), 4)

    # 1) Main config (f32, stride=1). DEFAULT MXU precision -> ~1e-3 rel error.
    B, L, C = 2, 8, 32
    x = jax.random.normal(keys[0], (B, L, C), dtype=jnp.float32)
    out = jax.block_until_ready(moving_avg(x, kernel_size=5, stride=1))
    ref = moving_avg_ref(x, kernel_size=5, stride=1)
    assert out.shape == ref.shape, (out.shape, ref.shape)
    assert jnp.allclose(out, ref, atol=3e-2, rtol=3e-2), "mismatch (f32, stride=1)"

    # 2) stride > 1 (folded into the averaging matrix).
    out = jax.block_until_ready(moving_avg(x, kernel_size=5, stride=2))
    ref = moving_avg_ref(x, kernel_size=5, stride=2)
    assert out.shape == ref.shape, (out.shape, ref.shape)
    assert jnp.allclose(out, ref, atol=3e-2, rtol=3e-2), "mismatch (f32, stride=2)"

    # 3) Ragged batch blocks (B=3 -> Bt=2, last block partially OOB).
    x3 = jax.random.normal(keys[1], (3, 16, 16), dtype=jnp.float32)
    out = jax.block_until_ready(moving_avg(x3, kernel_size=7, stride=1))
    ref = moving_avg_ref(x3, kernel_size=7, stride=1)
    assert out.shape == ref.shape, (out.shape, ref.shape)
    assert jnp.allclose(out, ref, atol=3e-2, rtol=3e-2), "mismatch (ragged batch)"

    # 4) Forced L_out tiling (block_rows=16 -> 3 output tiles, ragged last).
    x4 = jax.random.normal(keys[2], (2, 40, 16), dtype=jnp.float32)
    out = jax.block_until_ready(moving_avg(x4, kernel_size=9, stride=1, block_rows=16))
    ref = moving_avg_ref(x4, kernel_size=9, stride=1)
    assert out.shape == ref.shape, (out.shape, ref.shape)
    assert jnp.allclose(out, ref, atol=3e-2, rtol=3e-2), "mismatch (tiled L_out)"

    # 5) bf16 path: A cast to bf16, native single-pass MXU, f32 accumulation.
    xb = jax.random.normal(keys[3], (2, 24, 128), dtype=jnp.bfloat16)
    out = jax.block_until_ready(moving_avg(xb, kernel_size=5, stride=1))
    ref = moving_avg_ref(xb, kernel_size=5, stride=1)
    assert out.shape == ref.shape, (out.shape, ref.shape)
    assert jnp.allclose(out.astype(jnp.float32), ref, atol=5e-2, rtol=5e-2), \
        "mismatch (bf16)"

    print("KERNEL_OK")
</pallas_src>

<mosaic_0001>
module attributes {stable_mosaic.version = 11 : i64} {
  func.func @_moving_avg_kernel(%arg0: i32, %arg1: i32, %arg2: i32, %arg3: memref<8x8xf32, #tpu.memory_space<vmem>>, %arg4: memref<1x8x32xf32, #tpu.memory_space<vmem>>, %arg5: memref<1x8x32xf32, #tpu.memory_space<vmem>>) attributes {dimension_semantics = [#tpu.dimension_semantics<parallel>, #tpu.dimension_semantics<parallel>, #tpu.dimension_semantics<parallel>], iteration_bounds = array<i64: 2, 1, 1>, scalar_prefetch = 0 : i64, scratch_operands = 0 : i64, tpu.core_type = #tpu.core_type<tc>, window_params = [{transform_indices = @transform_0, window_bounds = array<i64: 8, 8>}, {transform_indices = @transform_1, window_bounds = array<i64: 1, 8, 32>}, {transform_indices = @transform_2, window_bounds = array<i64: 1, 8, 32>}]} {
    %c0 = arith.constant 0 : index
    %c0_0 = arith.constant 0 : index
    %0 = vector.load %arg3[%c0, %c0_0] : memref<8x8xf32, #tpu.memory_space<vmem>>, vector<8x8xf32>
    %c0_1 = arith.constant 0 : index
    %c0_2 = arith.constant 0 : index
    %c0_3 = arith.constant 0 : index
    %1 = vector.load %arg4[%c0_1, %c0_2, %c0_3] : memref<1x8x32xf32, #tpu.memory_space<vmem>>, vector<1x8x32xf32>
    %2 = vector.shape_cast %1 : vector<1x8x32xf32> to vector<8x32xf32>
    %cst = arith.constant dense<0.000000e+00> : vector<8x32xf32>
    %3 = tpu.matmul %0, %2, %cst {dimension_numbers = #tpu.dot_dimension_numbers<[1], [0], [0], [1], [0, 0, 1, 1], [], []>} : vector<8x8xf32>, vector<8x32xf32>, vector<8x32xf32> -> vector<8x32xf32>
    %c0_4 = arith.constant 0 : index
    %c0_5 = arith.constant 0 : index
    %c0_6 = arith.constant 0 : index
    %4 = vector.load %arg5[%c0_4, %c0_5, %c0_6] : memref<1x8x32xf32, #tpu.memory_space<vmem>>, vector<1x8x32xf32>
    %5 = vector.shape_cast %4 : vector<1x8x32xf32> to vector<8x32xf32>
    %6 = vector.shape_cast %3 : vector<8x32xf32> to vector<1x8x32xf32>
    tpu.vector_store %arg5[%c0_4, %c0_5, %c0_6], %6 {strides = array<i32>} : memref<1x8x32xf32, #tpu.memory_space<vmem>>, vector<1x8x32xf32>,
    return
  }
  func.func @transform_0(%arg0: i32, %arg1: i32, %arg2: i32) -> (i32, i32) {
    %c0_i32 = arith.constant 0 : i32
    %c0_i32_0 = arith.constant 0 : i32
    return %arg2, %c0_i32 : i32, i32
  }
  func.func @transform_1(%arg0: i32, %arg1: i32, %arg2: i32) -> (i32, i32, i32) {
    %c0_i32 = arith.constant 0 : i32
    %c0_i32_0 = arith.constant 0 : i32
    return %arg0, %c0_i32, %arg1 : i32, i32, i32
  }
  func.func @transform_2(%arg0: i32, %arg1: i32, %arg2: i32) -> (i32, i32, i32) {
    %c0_i32 = arith.constant 0 : i32
    return %arg0, %arg2, %arg1 : i32, i32, i32
  }
}

</mosaic_0001>

<bundles_post_ra>
// kernel: tpu_custom_call.1
= control target key start
LH: loop header
LB: loop body
LE: loop exit
PB: predicated region body
PF: predicated region fallthrough
CT: control target
= control target key end

     0   :  { %7 = vsyncpa [#allocation3], 0  ;;  %s877_s0 = inlined_call_operand.hbm [shape: f32[8,8], index: 0, kind: input, shape index: {}]   ;;  %s878_s1 = inlined_call_operand.hbm [shape: f32[2,8,32], index: 1, kind: input, shape index: {}]   ;;  %s879_s2 = inlined_call_operand.hbm [shape: f32[2,8,32], index: 2, kind: output, shape index: {}]  }
   0x1   :  { %8 = vsyncpa [#allocation6], 0 }
   0x2   :  { %10 = vsyncpa [#allocation6 + $0x1], 0 }
   0x3   :  { %11 = vsyncpa [#allocation4], 0 }
   0x4   :  { %13 = vsyncpa [#allocation4 + $0x1], 0  ;;  %s661_s9 = smov 0   ;;  %s663_s10 = smov 0  }
   0x5   :  { %s665_s11 = smov 0   ;;  %s667_s12 = smov 0  }
   0x6   :  { %s669_s13 = smov 0   ;;  %s671_s14 = smov 0  }
   0x7 LB: > { %s397_s15 = sadd.s32 4294967295, %s639_s14   ;;  %s398_s16 = sadd.s32 4294967294, %s639_s14   ;;  %s639_s14 = sphi %s671_s14, %s19_s14   ;;  %s635_s13 = sphi %s669_s13, %s904_s13   ;;  %s631_s12 = sphi %s667_s12, %s903_s12   ;;  %s627_s11 = sphi %s665_s11, %s902_s11   ;;  %s623_s10 = sphi %s663_s10, %s901_s10   ;;  %s619_s9 = sphi %s661_s9, %s900_s9  }
   0x8   : > { %p86_p0 = scmp.ne.s32.totalorder %s623_s10, %s619_s9  ;;  %p695_p1 = scmp.eq.s32.totalorder %s397_s15, 0 }
   0x9   : > { %p699_p2 = scmp.eq.s32.totalorder %s397_s15, 1  ;;  %p120_p3 = scmp.eq.s32.totalorder %s398_s16, 1 }
   0xa   : > { %s884_s17 = scalar_select %p695_p1, 1, 0 }
   0xb   : > { %s885_s18 = scalar_select %p699_p2, 1, 0 }
   0xc   : > { %p705_p4 = por %p695_p1, %p86_p0  ;;  %p399_p5 = scmp.ge.s32.totalorder %s639_s14, 1 }
   0xd   : > { %p710_p6 = por %p120_p3, %p86_p0  ;;  %p127_p7 = scmp.lt.s32.totalorder %s639_s14, 3 }
   0xe   : > { %s886_s19 = scalar_select %p705_p4, 1, 0 }
   0xf   : > { %s887_s20 = scalar_select %p710_p6, 1, 0 }
  0x10   : > { %p715_p8 = pnand %p399_p5, %p127_p7  ;;  %s641_s22 = smov [#allocation2]  }
  0x11   : > { %s142_s23 = sshll.u32 %s641_s22, 4  ;;  %s38_s25 = sadd.s32 1, %s635_s13  ;;  %s143_s23 = int_to_ptr.vmem [resolvable:$true] %s142_s23 }
  0x12   : > { %s888_s21 = scalar_select %p715_p8, 1, 0 }
  0x13   : > { %p428_p10 = pneg %p715_p8  ;;  %s73_s26 = sadd.s32 1, %s627_s11 }
  0x14   : > { %p730_p12 = scmp.ge.s32.totalorder %s38_s25, 2  ;;  %s495_s30 = scalar_lea.hbm %s877_s0, 128 }
  0x15   : > { %p724_p11 = pnand %p428_p10, %p695_p1  ;;  %p496_p13 = scmp.ne.s32.totalorder %s877_s0, %s495_s30 }
  0x16   : > { %s890_s27 = scalar_select %p730_p12, 1, 0 }
  0x17   : > { %p497_p0 = pneg %p724_p11  ;;  %p502_p7 = scmp.lt.u32.totalorder %s495_s30, %s877_s0 }
  0x19   : > { %p498_p3 = pnand %p497_p0, %p496_p13 }
  0x1b   : > { %p499_p5 = pneg %p498_p3 }
  0x1d   : > { %p504_p10 = pnand %p502_p7, %p499_p5 }
  0x1f   : > { %507 = shalt.err (!%p504_p10)
}
  0x20   : > { %s508_s7 = scalar_lea.vmem %s143_s23, 128  ;;  %p516_p1 = scmp.lt.s32.totalorder %s143_s23, %s143_s23 }
  0x21   : > { %p509_p9 = scmp.ne.s32.totalorder %s143_s23, %s508_s7  ;;  %p517_p8 = scmp.lt.s32.totalorder %s508_s7, %s508_s7 }
  0x23   : > { %p511_p6 = pnand %p509_p9, %p497_p0  ;;  %p518_p2 = por %p517_p8, %p516_p1 }
  0x25   : > { %p512_p4 = pneg %p511_p6 }
  0x27   : > { %p519_p12 = pnand %p518_p2, %p512_p4 }
  0x29   : > { %522 = shalt.err (!%p519_p12)
}
  0x2a   : > { %431 = dma.hbm_to_vmem [thread:$0]  (!%p724_p11), %s877_s0, 128, %s143_s23, [#allocation3]  }
  0x2b   : > { %p891_p1 = scmp.ne.s32.totalorder %s890_s27, 0  ;;  %p80_p2 = scmp.ne.s32.totalorder %s627_s11, %s623_s10 }
  0x2c   : > { %p81_p4 = scmp.eq.s32.totalorder %s639_s14, 0  ;;  %p441_p6 = scmp.lt.s32.totalorder %s639_s14, 2 }
  0x2d   : > { %s906_s25 = smov (%p891_p1, %s38_s25), 0  ;;  %p892_p12 = scmp.ne.s32.totalorder %s885_s18, 0 }
  0x2e   : > { %s68_s16 = ssub.s32 %s635_s13, %s906_s25  ;;  %p82_p9 = por %p81_p4, %p80_p2 }
  0x2f   : > { %p71_p8 = scmp.eq.s32.totalorder %s68_s16, 0  ;;  %p762_p13 = por %p892_p12, %p80_p2 }
  0x30   : > { %s153_s24 = sand.u32 1, %s627_s11   ;;  %s403_s27 = sshll.u32 %s635_s13, 7 }
  0x31   : > { %s770_s28 = scalar_select %p71_p8, %s627_s11, %s73_s26  }
  0x32   : > { %s402_s23 = sshll.u32 %s153_s24, 3  ;;  %s776_s3 = scalar_lea.hbm %s878_s1, %s403_s27 }
  0x33   : > { %s157_s18 = scalar_lea.vmem [#allocation5], %s402_s23  ;;  %p780_p11 = pnand %p441_p6, %p82_p9 }
  0x34   : > { %s165_s4 = sshll.u32 %s157_s18, 4  ;;  %s154_s26 = scalar_lea.sflag [#allocation6], %s153_s24  ;;  %s778_s4 = int_to_ptr.vmem [resolvable:$true] %s165_s4 }
  0x35   : > { %s523_s6 = scalar_lea.hbm %s776_s3, 128  ;;  %p525_p3 = pneg %p780_p11 }
  0x36   : > { %p524_p0 = scmp.ne.s32.totalorder %s776_s3, %s523_s6  ;;  %s528_s15 = scalar_lea.hbm %s878_s1, 256 }
  0x37   : > { %p529_p10 = scmp.lt.u32.totalorder %s776_s3, %s878_s1  ;;  %p530_p1 = scmp.lt.u32.totalorder %s528_s15, %s523_s6 }
  0x38   : > { %p526_p5 = pnand %p525_p3, %p524_p0  ;;  %p532_p4 = scmp.lt.u32.totalorder %s523_s6, %s776_s3 }
  0x39   : > { %p531_p2 = por %p530_p1, %p529_p10 }
  0x3a   : > { %p527_p7 = pneg %p526_p5 }
  0x3b   : > { %p533_p6 = por %p532_p4, %p531_p2 }
  0x3d   : > { %p534_p8 = pnand %p533_p6, %p527_p7 }
  0x3f   : > { %537 = shalt.err (!%p534_p8)
}
  0x40   : > { %s538_s24 = scalar_lea.vmem %s778_s4, 128  ;;  %s642_s27 = smov [#allocation5]  }
  0x41   : > { %p539_p9 = scmp.ne.s32.totalorder %s778_s4, %s538_s24  ;;  %s543_s29 = sshll.u32 %s642_s27, 4  ;;  %s544_s29 = int_to_ptr.vmem [resolvable:$false] %s543_s29 }
  0x42   : > { %s545_s30 = scalar_lea.vmem %s544_s29, 256  ;;  %p546_p5 = scmp.lt.s32.totalorder %s778_s4, %s544_s29 }
  0x43   : > { %p541_p12 = pnand %p539_p9, %p525_p3  ;;  %p547_p10 = scmp.lt.s32.totalorder %s545_s30, %s538_s24 }
  0x45   : > { %p542_p0 = pneg %p541_p12  ;;  %p548_p1 = por %p547_p10, %p546_p5 }
  0x47   : > { %p549_p2 = pnand %p548_p1, %p542_p0 }
  0x49   : > { %552 = shalt.err (!%p549_p2)
}
  0x4a   : > { %435 = dma.hbm_to_vmem [thread:$0]  (!%p780_p11), %s776_s3, 128, %s778_s4, %s154_s26  }
  0x4b   : > { %p895_p7 = scmp.ne.s32.totalorder %s888_s21, 0 }
  0x4c   : > { %p896_p3 = scmp.ne.s32.totalorder (!%p895_p7), %s884_s17, 0 }
  0x4d   : > { %174 = sbr.rel (%p895_p7) target bundleno = 318 (0x13e), region = 28 }
  0x54   : > { %606 = dma.done.wait (%p896_p3), [#allocation3], 128  }
  0x55   : > { %608 = vsyncadd (%p896_p3), [#allocation3], 4294967168  ;;  %s816_s18 = sand.u32 1, %s623_s10   ;;  %p897_p4 = scmp.ne.s32.totalorder %s886_s19, 0 }
  0x56   : > { %s406_s6 = sshll.u32 %s816_s18, 3  ;;  %s181_s5 = scalar_lea.sflag [#allocation6], %s816_s18 }
  0x57   : > { %s184_s7 = scalar_lea.vmem [#allocation5], %s406_s6 }
  0x58   : > { %610 = dma.done.wait (%p897_p4), %s181_s5, 128  }
  0x59   : > { %612 = vsyncadd (%p897_p4), %s181_s5, 4294967168  ;;  %v643_v0 = vmov 0.0   ;;  %vm644_vm0 = vmmov 0   ;;  %vm207_vm1 = vcmask 64512   ;;  %v206_v1 = vld [vmem:[%s184_s7] sm:$0xff]  ;;  %v205_v2 = vld [vmem:[#allocation2] sm:$0xff] }
  0x5a   : > { %415 = vmatprep.subr.mxu0 %v643_v0  ;;  %417 = vmatprep.mubr.msk.f32.mxu0 %vm644_vm0, %v643_v0  ;;  %s410_s17 = sshll.u32 %s631_s12, 7  ;;  %s204_s21 = scalar_lea.vmem [#allocation7], %s406_s6  ;;  %vm281_vm2 = vcmask 261120  }
  0x5b   : > { %416 = vmatpush3.msra.mxu0 %v206_v1  ;;  %s299_s3 = sshll.u32 %s204_s21, 4  ;;  %s828_s19 = scalar_lea.hbm %s879_s2, %s410_s17  ;;  %s830_s3 = int_to_ptr.vmem [resolvable:$true] %s299_s3 }
  0x5c   : > { %418 = vmatmul.mubr.msk.f32.vlgmr.msra.gmra.mrb[0].mxu0 %vm207_vm1, %v205_v2  ;;  %s284_s8 = scalar_lea.sflag [#allocation4], %s816_s18  ;;  %s553_s15 = scalar_lea.vmem %s830_s3, 128 }
  0x5d   : > { %p554_p11 = scmp.ne.s32.totalorder %s830_s3, %s553_s15  ;;  %s645_s12 = smov [#allocation7]  }
  0x5e   : > { %s557_s16 = sshll.u32 %s645_s12, 4  ;;  %s558_s16 = int_to_ptr.vmem [resolvable:$false] %s557_s16 }
  0x5f   : > { %p555_p6 = pnand %p554_p11, %p762_p13  ;;  %s559_s23 = scalar_lea.vmem %s558_s16, 256 }
  0x60   : > { %p560_p9 = scmp.lt.s32.totalorder %s830_s3, %s558_s16  ;;  %p561_p12 = scmp.lt.s32.totalorder %s559_s23, %s553_s15 }
  0x61   : > { %p556_p8 = pneg %p555_p6 }
  0x62   : > { %p562_p0 = por %p561_p12, %p560_p9 }
  0x64   : > { %p563_p5 = pnand %p562_p0, %p556_p8 }
 0x12f   : > { %v277_v3 = vpop.f32.mrb[0].mxu0 }
 0x130   : > { %282 = vst.msk [vmem:[%s204_s21] sm:$0xff] %vm281_vm2, %v277_v3  ;;  %v419_v4 = vpop.f32.mrb[1].mxu0 }
 0x131   : > { %566 = shalt.err (!%p563_p5)
}
 0x132   : > { %s567_s24 = scalar_lea.hbm %s828_s19, 128  ;;  %s571_s30 = scalar_lea.hbm %s879_s2, 256 }
 0x133   : > { %p568_p10 = scmp.ne.s32.totalorder %s828_s19, %s567_s24  ;;  %p572_p7 = scmp.lt.u32.totalorder %s828_s19, %s879_s2 }
 0x134   : > { %p573_p3 = scmp.lt.u32.totalorder %s571_s30, %s567_s24  ;;  %p575_p11 = scmp.lt.u32.totalorder %s567_s24, %s828_s19 }
 0x135   : > { %p569_p1 = pnand %p568_p10, %p762_p13 }
 0x136   : > { %p574_p4 = por %p573_p3, %p572_p7 }
 0x137   : > { %p570_p2 = pneg %p569_p1 }
 0x138   : > { %p576_p6 = por %p575_p11, %p574_p4 }
 0x13a   : > { %p577_p8 = pnand %p576_p6, %p570_p2 }
 0x13c   : > { %580 = shalt.err (!%p577_p8)
}
 0x13d   : > { %426 = dma.vmem_to_hbm [thread:$0]  (%p762_p13), %s830_s3, 128, %s828_s19, %s284_s8  }
 0x13e PF: > { %s311_s5 = sand.u32 1, %s619_s9   ;;  %p898_p9 = scmp.ne.s32.totalorder %s887_s20, 0 }
 0x13f   : > { %p899_p12 = scmp.ge.s32.totalorder %s639_s14, 2  ;;  %s312_s7 = scalar_lea.sflag [#allocation4], %s311_s5 }
 0x141   : > { %p437_p0 = pnand %p899_p12, %p898_p9 }
 0x143   : > { %614 = dma.done.wait (!%p437_p0), %s312_s7, 128  }
 0x144   : > { %616 = vsyncadd (!%p437_p0), %s312_s7, 4294967168  ;;  %s19_s14 = sadd.s32 1, %s639_s14   ;;  %s900_s9 = smov %s623_s10 }
 0x145   : > { %p16_p5 = scmp.ge.s32.totalorder %s19_s14, 4   ;;  %s901_s10 = smov %s627_s11 }
 0x146   : > { %s902_s11 = smov %s770_s28  ;;  %s903_s12 = smov %s635_s13 }
 0x147   : > { %s904_s13 = smov %s906_s25  ;;  %18 = sbr.rel (!%p16_p5) target bundleno = 7 (0x7), region = 79 }
 0x14e   :  { %317 = vsyncpa [#allocation3], 1 }
 0x14f   :  { %319 = vsyncpa [#allocation3 + $0x1], 1 }
 0x150   :  { %320 = vsyncpa [#allocation6], 1 }
 0x151   :  { %322 = vsyncpa [#allocation6 + $0x1], 1 }
 0x152   :  { %323 = vsyncpa [#allocation4], 1 }
 0x153   :  { %325 = vsyncpa [#allocation4 + $0x1], 1 }

</bundles_post_ra>
